<compile_context>
chip_gen: v5e
topology: v5e:2x2
jax: 0.10.0
libtpu: 0.0.40
codegen_flags: <defaults>
</compile_context>

<pallas_src>
import jax
import jax.numpy as jnp
from jax.experimental import pallas as pl
from jax.experimental.pallas import tpu as pltpu

LANE = 128     # vreg lane width (last dim)
SUBLANE = 8    # f32 sublane count (second-to-last dim)


def _round_up(x, m):
    return ((x + m - 1) // m) * m


def _pick_batch_tile(batch, widest_pad, itemsize, vmem_budget_bytes=16 * 1024 * 1024):
    """Largest batch tile (multiple of 8, <= 512) whose double-buffered in/out tiles fit
    comfortably inside the VMEM budget (sized for v7x's smaller 64 MiB VMEM)."""
    tb = min(_round_up(batch, SUBLANE), 512)
    while tb > SUBLANE and 4 * tb * widest_pad * itemsize > vmem_budget_bytes:
        tb = _round_up(tb // 2, SUBLANE)
    return max(tb, SUBLANE)


def _make_fused_kernel(layer_dims, do_layernorm, suppress_final_activation, eps=1e-5):
    """Fused multi-layer projection kernel.

    layer_dims: tuple of (d_in_true, d_in_pad, d_out_true, d_out_pad) per layer.
    Ref order: x_ref, w_0 ... w_{n-1}, b_0 ... b_{n-1}, o_ref
      x_ref: (TB, d_in_pad0)            VMEM (batch tile)
      w_i:   (d_in_pad_i, d_out_pad_i)  VMEM (pre-transposed, zero-padded)
      b_i:   (1, d_out_pad_i)           VMEM (zero-padded bias row)
      o_ref: (TB, d_out_pad_last)       VMEM
    """
    n_layers = len(layer_dims)

    def kernel(x_ref, *refs):
        w_refs = refs[:n_layers]
        b_refs = refs[n_layers:2 * n_layers]
        o_ref = refs[2 * n_layers]

        x = x_ref[...]
        for i, (d_in_true, d_in_pad, d_out_true, d_out_pad) in enumerate(layer_dims):
            # Dropout (p=0.15) is identity in eval mode.
            # TODO(synk): training-mode dropout not implemented (eval forward only).
            if do_layernorm and i > 0:
                # Padded lanes of x are exactly zero, so sums over the padded width equal
                # sums over the true hidden width; divide by the TRUE hidden dim.
                xf = x.astype(jnp.float32)
                inv_n = 1.0 / float(d_in_true)
                mean = jnp.sum(xf, axis=-1, keepdims=True) * inv_n
                mean_sq = jnp.sum(xf * xf, axis=-1, keepdims=True) * inv_n
                var = mean_sq - mean * mean
                x = (xf - mean) * jax.lax.rsqrt(var + eps)
                # (padded lanes become -mean*rsqrt, but the corresponding padded weight
                #  rows are zero, so they contribute nothing to the matmul.)
            w = w_refs[i][...]
            y = jnp.dot(x.astype(w.dtype), w, preferred_element_type=jnp.float32)
            y = y + b_refs[i][...].astype(jnp.float32)
            if not (suppress_final_activation and i == n_layers - 1):
                y = jnp.maximum(y, 0.0)
            x = y  # f32 carried activation; padded out-lanes are exactly zero again.
        o_ref[...] = x.astype(o_ref.dtype)

    return kernel


def init_params(key, in_dim, out_dim, n_layers, hidden_dim=None, dtype=jnp.float32):
    """Deterministic init matching the PyTorch module: W ~ N(0, 0.01), b = 0.
    Weights stored pre-transposed as [d_in, d_out]."""
    hidden_dim = hidden_dim if hidden_dim is not None else in_dim
    params = []
    for i in range(n_layers):
        d_in = in_dim if i == 0 else hidden_dim
        d_out = out_dim if i == n_layers - 1 else hidden_dim
        key, wkey = jax.random.split(key)
        w = (0.01 * jax.random.normal(wkey, (d_in, d_out))).astype(dtype)
        b = jnp.zeros((1, d_out), dtype=dtype)
        params.append((w, b))
    return params


def raw_data_projection_forward(
    x,
    params,
    *,
    do_layernorm=False,
    suppress_final_activation=False,
    compute_dtype=None,     # e.g. jnp.bfloat16 for full-rate MXU; None -> param dtype
    batch_tile=None,
):
    """Pallas implementation of RawDataProjectionModule.forward (eval mode)."""
    # TODO(synk): do_batchnorm branch (BatchNorm1d with running stats) not implemented.
    n_layers = len(params)
    B, d0 = x.shape
    out_dtype = x.dtype

    # True and lane-dense (padded to multiples of 128) dims per layer.
    layer_dims = []
    d_in_true = d0
    for (w, _) in params:
        assert w.shape[0] == d_in_true, "weight shape mismatch with running feature dim"
        d_out_true = w.shape[1]
        layer_dims.append((d_in_true, _round_up(d_in_true, LANE),
                           d_out_true, _round_up(d_out_true, LANE)))
        d_in_true = d_out_true
    layer_dims = tuple(layer_dims)
    out_dim = layer_dims[-1][2]
    out_pad = layer_dims[-1][3]
    in_pad = layer_dims[0][1]
    widest_pad = max(in_pad, max(d[3] for d in layer_dims))

    # Batch tiling: grid over batch tiles, marked "parallel" (megacore / 2-TC sharding).
    if batch_tile is not None:
        tb = _round_up(int(batch_tile), SUBLANE)
    else:
        tb = _pick_batch_tile(B, widest_pad, 4)
    b_pad = _round_up(B, tb)
    grid = (b_pad // tb,)

    # Zero-pad activations / weights / biases to lane-dense shapes.
    x_p = jnp.pad(x, ((0, b_pad - B), (0, in_pad - d0)))
    if compute_dtype is not None:
        # Cast the input once in the wrapper -> halves the input HBM traffic for bf16.
        x_p = x_p.astype(compute_dtype)
    w_ps = []
    b_ps = []
    for (w, b), (dit, dip, dot_, dop) in zip(params, layer_dims):
        w_p = jnp.pad(w, ((0, dip - dit), (0, dop - dot_)))
        if compute_dtype is not None:
            w_p = w_p.astype(compute_dtype)
        w_ps.append(w_p)
        b_ps.append(jnp.pad(jnp.reshape(b, (1, -1)).astype(jnp.float32),
                            ((0, 0), (0, dop - dot_))))

    kernel = _make_fused_kernel(layer_dims, do_layernorm, suppress_final_activation)

    in_specs = [pl.BlockSpec((tb, in_pad), lambda i: (i, 0))]
    for (_, dip, _, dop) in layer_dims:
        # Full weight block, same index every step -> stays resident in VMEM.
        in_specs.append(pl.BlockSpec((dip, dop), lambda i: (0, 0)))
    for (_, _, _, dop) in layer_dims:
        in_specs.append(pl.BlockSpec((1, dop), lambda i: (0, 0)))
    out_specs = pl.BlockSpec((tb, out_pad), lambda i: (i, 0))

    # VMEM sizing + cost hint.
    w_bytes = sum(w.size * w.dtype.itemsize for w in w_ps)
    w_bytes += sum(b.size * b.dtype.itemsize for b in b_ps)
    act_bytes = 2 * tb * in_pad * x_p.dtype.itemsize + 2 * tb * out_pad * out_dtype.itemsize
    scratch_bytes = 4 * tb * widest_pad * 4  # headroom for f32 intermediates
    vmem_limit = int(min(64 * 1024 * 1024,
                         max(32 * 1024 * 1024,
                             2 * (w_bytes + act_bytes + scratch_bytes))))
    flops = 2 * b_pad * sum(dip * dop for (_, dip, _, dop) in layer_dims)
    transcendentals = (n_layers - 1) * b_pad if do_layernorm else 0
    bytes_accessed = (x_p.size * x_p.dtype.itemsize
                      + b_pad * out_pad * out_dtype.itemsize + w_bytes)

    out_p = pl.pallas_call(
        kernel,
        out_shape=jax.ShapeDtypeStruct((b_pad, out_pad), out_dtype),
        grid=grid,
        in_specs=in_specs,
        out_specs=out_specs,
        compiler_params=pltpu.CompilerParams(
            dimension_semantics=("parallel",),
            vmem_limit_bytes=vmem_limit,
        ),
        cost_estimate=pl.CostEstimate(
            flops=flops,
            transcendentals=transcendentals,
            bytes_accessed=bytes_accessed,
        ),
    )(x_p, *w_ps, *b_ps)

    return out_p[:B, :out_dim]


def _reference_forward(x, params, *, do_layernorm, suppress_final_activation):
    n_layers = len(params)
    for i, (w, b) in enumerate(params):
        if do_layernorm and i > 0:
            mean = jnp.mean(x, axis=-1, keepdims=True)
            var = jnp.mean((x - mean) ** 2, axis=-1, keepdims=True)
            x = (x - mean) * jax.lax.rsqrt(var + 1e-5)
        x = x @ w + b
        if not (suppress_final_activation and i == n_layers - 1):
            x = jnp.maximum(x, 0.0)
    return x


if __name__ == "__main__":
    key = jax.random.PRNGKey(0)

    # Config 1: small shapes consistent with the module (layernorm + suppressed final act).
    batch, in_dim, hidden_dim, out_dim, n_layers = 8, 32, 32, 16, 3
    key, xkey, pkey = jax.random.split(key, 3)
    x = jax.random.normal(xkey, (batch, in_dim), dtype=jnp.float32)
    params = init_params(pkey, in_dim, out_dim, n_layers, hidden_dim=hidden_dim)

    out = raw_data_projection_forward(
        x, params, do_layernorm=True, suppress_final_activation=True)
    out = jax.block_until_ready(out)
    ref = _reference_forward(x, params, do_layernorm=True, suppress_final_activation=True)
    assert out.shape == (batch, out_dim), out.shape
    assert jnp.allclose(out, ref, atol=1e-5, rtol=1e-5), "config1 mismatch vs reference"

    # Config 2: exercises batch tiling (grid > 1, 'parallel' axis) and the final-ReLU path.
    batch2, in_dim2, out_dim2, n_layers2 = 96, 48, 24, 2
    key, xkey2, pkey2 = jax.random.split(key, 3)
    x2 = jax.random.normal(xkey2, (batch2, in_dim2), dtype=jnp.float32)
    params2 = init_params(pkey2, in_dim2, out_dim2, n_layers2)
    out2 = raw_data_projection_forward(
        x2, params2, do_layernorm=True, suppress_final_activation=False, batch_tile=32)
    out2 = jax.block_until_ready(out2)
    ref2 = _reference_forward(x2, params2, do_layernorm=True, suppress_final_activation=False)
    assert out2.shape == (batch2, out_dim2), out2.shape
    assert jnp.allclose(out2, ref2, atol=1e-5, rtol=1e-5), "config2 mismatch vs reference"

    # Config 3: bf16 MXU path (f32 LayerNorm statistics, f32 accumulation) — loose tolerance.
    out3 = raw_data_projection_forward(
        x, params, do_layernorm=True, suppress_final_activation=True,
        compute_dtype=jnp.bfloat16)
    out3 = jax.block_until_ready(out3)
    assert jnp.allclose(out3, ref, atol=2e-2, rtol=2e-1), "bf16 path drifted too far"

    print("KERNEL_OK")
</pallas_src>

<mosaic_0001>
module attributes {stable_mosaic.version = 11 : i64} {
  func.func @kernel(%arg0: i32, %arg1: memref<8x128xf32, #tpu.memory_space<vmem>>, %arg2: memref<128x128xf32, #tpu.memory_space<vmem>>, %arg3: memref<128x128xf32, #tpu.memory_space<vmem>>, %arg4: memref<128x128xf32, #tpu.memory_space<vmem>>, %arg5: memref<1x128xf32, #tpu.memory_space<vmem>>, %arg6: memref<1x128xf32, #tpu.memory_space<vmem>>, %arg7: memref<1x128xf32, #tpu.memory_space<vmem>>, %arg8: memref<8x128xf32, #tpu.memory_space<vmem>>) attributes {dimension_semantics = [#tpu.dimension_semantics<parallel>], iteration_bounds = array<i64: 1>, scalar_prefetch = 0 : i64, scratch_operands = 0 : i64, tpu.core_type = #tpu.core_type<tc>, window_params = [{transform_indices = @transform_0, window_bounds = array<i64: 8, 128>}, {pipeline_mode = #tpu.pipeline_mode<synchronous>, transform_indices = @transform_1, window_bounds = array<i64: 128, 128>}, {pipeline_mode = #tpu.pipeline_mode<synchronous>, transform_indices = @transform_2, window_bounds = array<i64: 128, 128>}, {pipeline_mode = #tpu.pipeline_mode<synchronous>, transform_indices = @transform_3, window_bounds = array<i64: 128, 128>}, {pipeline_mode = #tpu.pipeline_mode<synchronous>, transform_indices = @transform_4, window_bounds = array<i64: 1, 128>}, {pipeline_mode = #tpu.pipeline_mode<synchronous>, transform_indices = @transform_5, window_bounds = array<i64: 1, 128>}, {pipeline_mode = #tpu.pipeline_mode<synchronous>, transform_indices = @transform_6, window_bounds = array<i64: 1, 128>}, {transform_indices = @transform_7, window_bounds = array<i64: 8, 128>}]} {
    %c0 = arith.constant 0 : index
    %c0_0 = arith.constant 0 : index
    %0 = vector.load %arg1[%c0, %c0_0] : memref<8x128xf32, #tpu.memory_space<vmem>>, vector<8x128xf32>
    %c0_1 = arith.constant 0 : index
    %c0_2 = arith.constant 0 : index
    %1 = vector.load %arg2[%c0_1, %c0_2] : memref<128x128xf32, #tpu.memory_space<vmem>>, vector<128x128xf32>
    %cst = arith.constant dense<0.000000e+00> : vector<8x128xf32>
    %2 = tpu.matmul %0, %1, %cst {dimension_numbers = #tpu.dot_dimension_numbers<[1], [0], [0], [1], [0, 0, 1, 1], [], []>} : vector<8x128xf32>, vector<128x128xf32>, vector<8x128xf32> -> vector<8x128xf32>
    %c0_3 = arith.constant 0 : index
    %c0_4 = arith.constant 0 : index
    %3 = vector.load %arg5[%c0_3, %c0_4] : memref<1x128xf32, #tpu.memory_space<vmem>>, vector<1x128xf32>
    %4 = vector.broadcast %3 : vector<1x128xf32> to vector<8x128xf32>
    %5 = arith.addf %2, %4 : vector<8x128xf32>
    %cst_5 = arith.constant 0.000000e+00 : f32
    %6 = vector.broadcast %cst_5 : f32 to vector<8x128xf32>
    %7 = arith.maximumf %5, %6 : vector<8x128xf32>
    %cst_6 = arith.constant dense<0.000000e+00> : vector<8xf32>
    %8 = vector.multi_reduction <add>, %7, %cst_6 [1] : vector<8x128xf32> to vector<8xf32>
    %9 = vector.shape_cast %8 : vector<8xf32> to vector<8x1xf32>
    %cst_7 = arith.constant 3.125000e-02 : f32
    %10 = vector.broadcast %cst_7 : f32 to vector<8x1xf32>
    %11 = arith.mulf %9, %10 : vector<8x1xf32>
    %12 = arith.mulf %7, %7 : vector<8x128xf32>
    %cst_8 = arith.constant dense<0.000000e+00> : vector<8xf32>
    %13 = vector.multi_reduction <add>, %12, %cst_8 [1] : vector<8x128xf32> to vector<8xf32>
    %14 = vector.shape_cast %13 : vector<8xf32> to vector<8x1xf32>
    %cst_9 = arith.constant 3.125000e-02 : f32
    %15 = vector.broadcast %cst_9 : f32 to vector<8x1xf32>
    %16 = arith.mulf %14, %15 : vector<8x1xf32>
    %17 = arith.mulf %11, %11 : vector<8x1xf32>
    %18 = arith.subf %16, %17 : vector<8x1xf32>
    %19 = vector.broadcast %11 : vector<8x1xf32> to vector<8x128xf32>
    %20 = arith.subf %7, %19 : vector<8x128xf32>
    %cst_10 = arith.constant 9.99999974E-6 : f32
    %21 = vector.broadcast %cst_10 : f32 to vector<8x1xf32>
    %22 = arith.addf %18, %21 : vector<8x1xf32>
    %23 = math.rsqrt %22 : vector<8x1xf32>
    %24 = vector.broadcast %23 : vector<8x1xf32> to vector<8x128xf32>
    %25 = arith.mulf %20, %24 : vector<8x128xf32>
    %c0_11 = arith.constant 0 : index
    %c0_12 = arith.constant 0 : index
    %26 = vector.load %arg3[%c0_11, %c0_12] : memref<128x128xf32, #tpu.memory_space<vmem>>, vector<128x128xf32>
    %cst_13 = arith.constant dense<0.000000e+00> : vector<8x128xf32>
    %27 = tpu.matmul %25, %26, %cst_13 {dimension_numbers = #tpu.dot_dimension_numbers<[1], [0], [0], [1], [0, 0, 1, 1], [], []>} : vector<8x128xf32>, vector<128x128xf32>, vector<8x128xf32> -> vector<8x128xf32>
    %c0_14 = arith.constant 0 : index
    %c0_15 = arith.constant 0 : index
    %28 = vector.load %arg6[%c0_14, %c0_15] : memref<1x128xf32, #tpu.memory_space<vmem>>, vector<1x128xf32>
    %29 = vector.broadcast %28 : vector<1x128xf32> to vector<8x128xf32>
    %30 = arith.addf %27, %29 : vector<8x128xf32>
    %cst_16 = arith.constant 0.000000e+00 : f32
    %31 = vector.broadcast %cst_16 : f32 to vector<8x128xf32>
    %32 = arith.maximumf %30, %31 : vector<8x128xf32>
    %cst_17 = arith.constant dense<0.000000e+00> : vector<8xf32>
    %33 = vector.multi_reduction <add>, %32, %cst_17 [1] : vector<8x128xf32> to vector<8xf32>
    %34 = vector.shape_cast %33 : vector<8xf32> to vector<8x1xf32>
    %cst_18 = arith.constant 3.125000e-02 : f32
    %35 = vector.broadcast %cst_18 : f32 to vector<8x1xf32>
    %36 = arith.mulf %34, %35 : vector<8x1xf32>
    %37 = arith.mulf %32, %32 : vector<8x128xf32>
    %cst_19 = arith.constant dense<0.000000e+00> : vector<8xf32>
    %38 = vector.multi_reduction <add>, %37, %cst_19 [1] : vector<8x128xf32> to vector<8xf32>
    %39 = vector.shape_cast %38 : vector<8xf32> to vector<8x1xf32>
    %cst_20 = arith.constant 3.125000e-02 : f32
    %40 = vector.broadcast %cst_20 : f32 to vector<8x1xf32>
    %41 = arith.mulf %39, %40 : vector<8x1xf32>
    %42 = arith.mulf %36, %36 : vector<8x1xf32>
    %43 = arith.subf %41, %42 : vector<8x1xf32>
    %44 = vector.broadcast %36 : vector<8x1xf32> to vector<8x128xf32>
    %45 = arith.subf %32, %44 : vector<8x128xf32>
    %cst_21 = arith.constant 9.99999974E-6 : f32
    %46 = vector.broadcast %cst_21 : f32 to vector<8x1xf32>
    %47 = arith.addf %43, %46 : vector<8x1xf32>
    %48 = math.rsqrt %47 : vector<8x1xf32>
    %49 = vector.broadcast %48 : vector<8x1xf32> to vector<8x128xf32>
    %50 = arith.mulf %45, %49 : vector<8x128xf32>
    %c0_22 = arith.constant 0 : index
    %c0_23 = arith.constant 0 : index
    %51 = vector.load %arg4[%c0_22, %c0_23] : memref<128x128xf32, #tpu.memory_space<vmem>>, vector<128x128xf32>
    %cst_24 = arith.constant dense<0.000000e+00> : vector<8x128xf32>
    %52 = tpu.matmul %50, %51, %cst_24 {dimension_numbers = #tpu.dot_dimension_numbers<[1], [0], [0], [1], [0, 0, 1, 1], [], []>} : vector<8x128xf32>, vector<128x128xf32>, vector<8x128xf32> -> vector<8x128xf32>
    %c0_25 = arith.constant 0 : index
    %c0_26 = arith.constant 0 : index
    %53 = vector.load %arg7[%c0_25, %c0_26] : memref<1x128xf32, #tpu.memory_space<vmem>>, vector<1x128xf32>
    %54 = vector.broadcast %53 : vector<1x128xf32> to vector<8x128xf32>
    %55 = arith.addf %52, %54 : vector<8x128xf32>
    %c0_27 = arith.constant 0 : index
    %c0_28 = arith.constant 0 : index
    %56 = vector.load %arg8[%c0_27, %c0_28] : memref<8x128xf32, #tpu.memory_space<vmem>>, vector<8x128xf32>
    tpu.vector_store %arg8[%c0_27, %c0_28], %55 {strides = array<i32>} : memref<8x128xf32, #tpu.memory_space<vmem>>, vector<8x128xf32>,
    return
  }
  func.func @transform_0(%arg0: i32) -> (i32, i32) {
    %c0_i32 = arith.constant 0 : i32
    %c0_i32_0 = arith.constant 0 : i32
    return %arg0, %c0_i32 : i32, i32
  }
  func.func @transform_1(%arg0: i32) -> (i32, i32) {
    %c0_i32 = arith.constant 0 : i32
    %c0_i32_0 = arith.constant 0 : i32
    %c0_i32_1 = arith.constant 0 : i32
    return %c0_i32, %c0_i32_0 : i32, i32
  }
  func.func @transform_2(%arg0: i32) -> (i32, i32) {
    %c0_i32 = arith.constant 0 : i32
    %c0_i32_0 = arith.constant 0 : i32
    %c0_i32_1 = arith.constant 0 : i32
    return %c0_i32, %c0_i32_0 : i32, i32
  }
  func.func @transform_3(%arg0: i32) -> (i32, i32) {
    %c0_i32 = arith.constant 0 : i32
    %c0_i32_0 = arith.constant 0 : i32
    %c0_i32_1 = arith.constant 0 : i32
    return %c0_i32, %c0_i32_0 : i32, i32
  }
  func.func @transform_4(%arg0: i32) -> (i32, i32) {
    %c0_i32 = arith.constant 0 : i32
    %c0_i32_0 = arith.constant 0 : i32
    %c0_i32_1 = arith.constant 0 : i32
    return %c0_i32, %c0_i32_0 : i32, i32
  }
  func.func @transform_5(%arg0: i32) -> (i32, i32) {
    %c0_i32 = arith.constant 0 : i32
    %c0_i32_0 = arith.constant 0 : i32
    %c0_i32_1 = arith.constant 0 : i32
    return %c0_i32, %c0_i32_0 : i32, i32
  }
  func.func @transform_6(%arg0: i32) -> (i32, i32) {
    %c0_i32 = arith.constant 0 : i32
    %c0_i32_0 = arith.constant 0 : i32
    %c0_i32_1 = arith.constant 0 : i32
    return %c0_i32, %c0_i32_0 : i32, i32
  }
  func.func @transform_7(%arg0: i32) -> (i32, i32) {
    %c0_i32 = arith.constant 0 : i32
    %c0_i32_0 = arith.constant 0 : i32
    return %arg0, %c0_i32 : i32, i32
  }
}

</mosaic_0001>

<bundles_post_ra>
// kernel: tpu_custom_call.1
= control target key start
LH: loop header
LB: loop body
LE: loop exit
PB: predicated region body
PF: predicated region fallthrough
CT: control target
= control target key end

     0   :  { %12 = vsyncpa [#allocation3], 0  ;;  %s488_s0 = inlined_call_operand.hbm [shape: f32[8,128], index: 0, kind: input, shape index: {}]   ;;  %s489_s1 = inlined_call_operand.hbm [shape: f32[128,128], index: 1, kind: input, shape index: {}]   ;;  %s490_s2 = inlined_call_operand.hbm [shape: f32[128,128], index: 2, kind: input, shape index: {}]   ;;  %s491_s3 = inlined_call_operand.hbm [shape: f32[128,128], index: 3, kind: input, shape index: {}]   ;;  %s492_s4 = inlined_call_operand.vmem [shape: f32[1,128], index: 4, kind: input, shape index: {}]   ;;  %s493_s5 = inlined_call_operand.vmem [shape: f32[1,128], index: 5, kind: input, shape index: {}]   ;;  %s494_s6 = inlined_call_operand.vmem [shape: f32[1,128], index: 6, kind: input, shape index: {}]   ;;  %s495_s7 = inlined_call_operand.hbm [shape: f32[8,128], index: 7, kind: output, shape index: {}]  }
   0x1   :  { %13 = vsyncpa [#allocation6], 0 }
   0x2   :  { %14 = vsyncpa [#allocation9], 0  ;;  %s31_s26 = sshll.u32 %s489_s1, 4  ;;  %s32_s26 = int_to_ptr.hbm [resolvable:$true] %s31_s26 }
   0x3   :  { %15 = vsyncpa [#allocation4], 0  ;;  %s417_s27 = smov [#allocation5]   ;;  %s21_s8 = sshll.u32 %s488_s0, 4  ;;  %s22_s8 = int_to_ptr.hbm [resolvable:$true] %s21_s8 }
   0x4   :  { %s33_s28 = sshll.u32 %s417_s27, 4  ;;  %s418_s9 = smov 128   ;;  %s34_s28 = int_to_ptr.vmem [resolvable:$true] %s33_s28 }
   0x5   :  { %s419_s10 = smov 8   ;;  %s420_s11 = smov [#allocation2]  }
   0x6   :  { %39 = dma.hbm_to_vmem [thread:$0]  %s32_s26, 2048, %s34_s28, [#allocation6], %s418_s9, %s418_s9, %s419_s10  }
   0x7   :  { %s23_s12 = sshll.u32 %s420_s11, 4  ;;  %s44_s15 = sshll.u32 %s490_s2, 4  ;;  %s24_s12 = int_to_ptr.vmem [resolvable:$true] %s23_s12  ;;  %s45_s15 = int_to_ptr.hbm [resolvable:$true] %s44_s15 }
   0x8   :  { %26 = dma.hbm_to_vmem [thread:$0]  %s22_s8, 128, %s24_s12, [#allocation3]  }
   0x9   :  { %s57_s17 = sshll.u32 %s491_s3, 4  ;;  %s421_s18 = smov [#allocation7]   ;;  %s58_s17 = int_to_ptr.hbm [resolvable:$true] %s57_s17 }
   0xa   :  { %s46_s19 = sshll.u32 %s421_s18, 4  ;;  %s422_s0 = smov [#allocation8]   ;;  %s47_s19 = int_to_ptr.vmem [resolvable:$true] %s46_s19 }
   0xb   :  { %52 = dma.hbm_to_vmem [thread:$0]  %s45_s15, 2048, %s47_s19, [#allocation6], %s418_s9, %s418_s9, %s419_s10  }
   0xc   :  { %s59_s20 = sshll.u32 %s422_s0, 4  ;;  %s60_s20 = int_to_ptr.vmem [resolvable:$true] %s59_s20 }
   0xd   :  { %65 = dma.hbm_to_vmem [thread:$0]  %s58_s17, 2048, %s60_s20, [#allocation9], %s418_s9, %s418_s9, %s419_s10  }
   0xe   :  { %409 = dma.done.wait [#allocation3], 128  }
   0xf   :  { %410 = vsyncadd [#allocation3], 4294967168 }
  0x10   :  { %411 = dma.done.wait [#allocation6], 4096  }
  0x11   :  { %412 = vsyncadd [#allocation6], 4294963200 }
  0x12   :  { %413 = dma.done.wait [#allocation9], 2048  }
  0x13   :  { %414 = vsyncadd [#allocation9], 4294965248  ;;  %v104_v0 = vld [vmem:[#allocation5 + $0x78] sm:$0xff]  ;;  %v103_v1 = vld [vmem:[#allocation5 + $0x70] sm:$0xff]  ;;  %s423_s23 = smov [#allocation10]   ;;  %s263_s27 = sshll.u32 %s495_s7, 4  ;;  %s264_s27 = int_to_ptr.hbm [resolvable:$true] %s263_s27 }
  0x14   :  { %109 = vmatpush.msra.mxu0 %v104_v0  ;;  %v102_v2 = vld [vmem:[#allocation5 + $0x68] sm:$0xff]  ;;  %v101_v3 = vld [vmem:[#allocation5 + $0x60] sm:$0xff]  ;;  %v100_v4 = vld [vmem:[#allocation5 + $0x58] sm:$0xff]  ;;  %s261_s24 = sshll.u32 %s423_s23, 4  ;;  %s262_s24 = int_to_ptr.vmem [resolvable:$true] %s261_s24 }
  0x15   :  { %v99_v5 = vld [vmem:[#allocation5 + $0x50] sm:$0xff]  ;;  %v98_v6 = vld [vmem:[#allocation5 + $0x48] sm:$0xff]  ;;  %v97_v7 = vld [vmem:[#allocation5 + $0x40] sm:$0xff] }
  0x16   :  { %110 = vmatpush.msra.mxu0 %v103_v1  ;;  %v96_v8 = vld [vmem:[#allocation5 + $0x38] sm:$0xff]  ;;  %v95_v9 = vld [vmem:[#allocation5 + $0x30] sm:$0xff]  ;;  %v94_v10 = vld [vmem:[#allocation5 + $0x28] sm:$0xff] }
  0x17   :  { %v93_v11 = vld [vmem:[#allocation5 + $0x20] sm:$0xff]  ;;  %v92_v12 = vld [vmem:[#allocation5 + $0x18] sm:$0xff]  ;;  %v91_v13 = vld [vmem:[#allocation5 + $0x10] sm:$0xff] }
  0x18   :  { %111 = vmatpush.msra.mxu0 %v102_v2  ;;  %v90_v14 = vld [vmem:[#allocation5 + $0x8] sm:$0xff]  ;;  %v89_v15 = vld [vmem:[#allocation5] sm:$0xff]  ;;  %v88_v16 = vld [vmem:[#allocation2] sm:$0xff] }
  0x19   :  { %v282_v17 = vld [vmem:[%s492_s4] ss:$0 sm:$0xff]  ;;  %v166_v23 = vld [vmem:[#allocation7 + $0x70] sm:$0xff]  ;;  %v165_v24 = vld [vmem:[#allocation7 + $0x68] sm:$0xff] }
  0x1a   :  { %112 = vmatpush.msra.mxu0 %v101_v3  ;;  %v167_v22 = vld [vmem:[#allocation7 + $0x78] sm:$0xff]  ;;  %v164_v25 = vld [vmem:[#allocation7 + $0x60] sm:$0xff]  ;;  %v162_v27 = vld [vmem:[#allocation7 + $0x50] sm:$0xff] }
  0x1b   :  { %172 = vmatpush.msra.mxu1 %v167_v22  ;;  %v163_v26 = vld [vmem:[#allocation7 + $0x58] sm:$0xff]  ;;  %v161_v28 = vld [vmem:[#allocation7 + $0x48] sm:$0xff]  ;;  %v160_v29 = vld [vmem:[#allocation7 + $0x40] sm:$0xff] }
  0x1c   :  { %113 = vmatpush.msra.mxu0 %v100_v4  ;;  %v159_v30 = vld [vmem:[#allocation7 + $0x38] sm:$0xff]  ;;  %v158_v31 = vld [vmem:[#allocation7 + $0x30] sm:$0xff]  ;;  %v157_v32 = vld [vmem:[#allocation7 + $0x28] sm:$0xff] }
  0x1d   :  { %173 = vmatpush.msra.mxu1 %v166_v23  ;;  %v156_v33 = vld [vmem:[#allocation7 + $0x20] sm:$0xff]  ;;  %v155_v34 = vld [vmem:[#allocation7 + $0x18] sm:$0xff]  ;;  %v154_v35 = vld [vmem:[#allocation7 + $0x10] sm:$0xff] }
  0x1e   :  { %114 = vmatpush.msra.mxu0 %v99_v5  ;;  %v153_v36 = vld [vmem:[#allocation7 + $0x8] sm:$0xff]  ;;  %v152_v37 = vld [vmem:[#allocation7] sm:$0xff]  ;;  %v283_v54 = vld [vmem:[%s493_s5] ss:$0 sm:$0xff] }
  0x1f   :  { %174 = vmatpush.msra.mxu1 %v165_v24  ;;  %v230_v59 = vld [vmem:[#allocation8 + $0x78] sm:$0xff]  ;;  %v229_v60 = vld [vmem:[#allocation8 + $0x70] sm:$0xff]  ;;  %v228_v61 = vld [vmem:[#allocation8 + $0x68] sm:$0xff] }
  0x20   :  { %115 = vmatpush.msra.mxu0 %v98_v6  ;;  %235 = vmatpush.msra.mxu2 %v230_v59  ;;  %v227_v62 = vld [vmem:[#allocation8 + $0x60] sm:$0xff]  ;;  %v226_v63 = vld [vmem:[#allocation8 + $0x58] sm:$0xff]  ;;  %v225_v0 = vld [vmem:[#allocation8 + $0x50] sm:$0xff] }
  0x21   :  { %175 = vmatpush.msra.mxu1 %v164_v25  ;;  %v224_v1 = vld [vmem:[#allocation8 + $0x48] sm:$0xff]  ;;  %v223_v2 = vld [vmem:[#allocation8 + $0x40] sm:$0xff]  ;;  %v222_v3 = vld [vmem:[#allocation8 + $0x38] sm:$0xff] }
  0x22   :  { %116 = vmatpush.msra.mxu0 %v97_v7  ;;  %236 = vmatpush.msra.mxu2 %v229_v60  ;;  %v221_v4 = vld [vmem:[#allocation8 + $0x30] sm:$0xff]  ;;  %v220_v5 = vld [vmem:[#allocation8 + $0x28] sm:$0xff]  ;;  %v219_v6 = vld [vmem:[#allocation8 + $0x20] sm:$0xff] }
  0x23   :  { %176 = vmatpush.msra.mxu1 %v163_v26  ;;  %v218_v7 = vld [vmem:[#allocation8 + $0x18] sm:$0xff] }
  0x24   :  { %117 = vmatpush.msra.mxu0 %v96_v8  ;;  %237 = vmatpush.msra.mxu2 %v228_v61  ;;  %v217_v8 = vld [vmem:[#allocation8 + $0x10] sm:$0xff] }
  0x25   :  { %177 = vmatpush.msra.mxu1 %v162_v27  ;;  %v284_v27 = vld [vmem:[%s494_s6] ss:$0 sm:$0xff] }
  0x26   :  { %118 = vmatpush.msra.mxu0 %v95_v9  ;;  %238 = vmatpush.msra.mxu2 %v227_v62  ;;  %v216_v9 = vld [vmem:[#allocation8 + $0x8] sm:$0xff] }
  0x27   :  { %178 = vmatpush.msra.mxu1 %v161_v28 }
  0x28   :  { %119 = vmatpush.msra.mxu0 %v94_v10  ;;  %239 = vmatpush.msra.mxu2 %v226_v63  ;;  %v215_v10 = vld [vmem:[#allocation8] sm:$0xff] }
  0x29   :  { %179 = vmatpush.msra.mxu1 %v160_v29 }
  0x2a   :  { %120 = vmatpush.msra.mxu0 %v93_v11  ;;  %240 = vmatpush.msra.mxu2 %v225_v0 }
  0x2b   :  { %180 = vmatpush.msra.mxu1 %v159_v30 }
  0x2c   :  { %121 = vmatpush.msra.mxu0 %v92_v12  ;;  %241 = vmatpush.msra.mxu2 %v224_v1 }
  0x2d   :  { %181 = vmatpush.msra.mxu1 %v158_v31 }
  0x2e   :  { %122 = vmatpush.msra.mxu0 %v91_v13  ;;  %242 = vmatpush.msra.mxu2 %v223_v2 }
  0x2f   :  { %182 = vmatpush.msra.mxu1 %v157_v32 }
  0x30   :  { %123 = vmatpush.msra.mxu0 %v90_v14  ;;  %243 = vmatpush.msra.mxu2 %v222_v3 }
  0x31   :  { %183 = vmatpush.msra.mxu1 %v156_v33 }
  0x32   :  { %124 = vmatpush.msra.mxu0 %v89_v15  ;;  %244 = vmatpush.msra.mxu2 %v221_v4 }
  0x33   :  { %125 = vmatmul.f32.vlgmr.msra.gmra.mxu0 %v88_v16  ;;  %184 = vmatpush.msra.mxu1 %v155_v34 }
  0x34   :  { %245 = vmatpush.msra.mxu2 %v220_v5 }
  0x35   :  { %185 = vmatpush.msra.mxu1 %v154_v35 }
  0x36   :  { %246 = vmatpush.msra.mxu2 %v219_v6 }
  0x37   :  { %186 = vmatpush.msra.mxu1 %v153_v36 }
  0x38   :  { %247 = vmatpush.msra.mxu2 %v218_v7 }
  0x39   :  { %187 = vmatpush.msra.mxu1 %v152_v37 }
  0x3a   :  { %248 = vmatpush.msra.mxu2 %v217_v8 }
  0x3c   :  { %249 = vmatpush.msra.mxu2 %v216_v9 }
  0x3e   :  { %250 = vmatpush.msra.mxu2 %v215_v10 }
  0xb0   :  { %v126_v18 = vpop.f32.mrf.mxu0 }
  0xb1   :  { %v127_v19 = vadd.f32 %v282_v17, %v126_v18 }
  0xb3   :  { %v129_v20 = vmax.f32 %v127_v19, 0.0 }
  0xb5   :  { %130 = vadd.xlane.f32.xlu0 %v129_v20  ;;  %v133_v21 = vmul.f32 %v129_v20, %v129_v20 }
  0xbd   :  { %134 = vadd.xlane.f32.xlu0 %v133_v21 }
 0x128   :  { %v131_v38 = vpop.xlane.xlu0 %130 }
 0x129   :  { %v132_v39 = vmul.f32 0.03125, %v131_v38 }
 0x12b   :  { %v137_v41 = vmul.f32 %v132_v39, %v132_v39  ;;  %v139_v51 = vsub.f32 %v129_v20, %v132_v39 }
 0x130   :  { %v135_v40 = vpop.xlane.xlu0 %134 }
 0x131   :  { %v136_v42 = vmul.f32 0.03125, %v135_v40 }
 0x133   :  { %v138_v43 = vsub.f32 %v136_v42, %v137_v41 }
 0x135   :  { %v140_v44 = vadd.f32 1e-05, %v138_v43 }
 0x137   :  { %285 = vrsqrt.f32 %v140_v44  ;;  %vm147_vm1 = vweird.f32 %v140_v44 }
 0x13d   :  { %v286_v45 = vpop.eup %285 }
 0x13e   :  { %v142_v46 = vmul.f32 %v286_v45, %v140_v44  ;;  %vm148_vm0 = vweird.f32 %v286_v45 }
 0x13f   :  { %vm149_vm2 = vmor %vm147_vm1, %vm148_vm0 }
 0x140   :  { %v143_v47 = vmul.f32 %v286_v45, %v142_v46 }
 0x142   :  { %v144_v48 = vmul.f32 0.5, %v143_v47 }
 0x144   :  { %v145_v49 = vsub.f32 1.5, %v144_v48 }
 0x146   :  { %v146_v50 = vmul.f32 %v286_v45, %v145_v49 }
 0x148   :  { %v150_v52 = vsel %vm149_vm2, %v286_v45, %v146_v50 }
 0x149   :  { %v151_v53 = vmul.f32 %v150_v52, %v139_v51 }
 0x14b   :  { %188 = vmatmul.f32.vlgmr.msra.gmra.mxu1 %v151_v53 }
 0x1c8   :  { %v189_v55 = vpop.f32.mrf.mxu1 }
 0x1c9   :  { %v190_v56 = vadd.f32 %v283_v54, %v189_v55 }
 0x1cb   :  { %v192_v57 = vmax.f32 %v190_v56, 0.0 }
 0x1cd   :  { %193 = vadd.xlane.f32.xlu1 %v192_v57  ;;  %v196_v58 = vmul.f32 %v192_v57, %v192_v57 }
 0x1d5   :  { %197 = vadd.xlane.f32.xlu1 %v196_v58 }
 0x240   :  { %v194_v11 = vpop.xlane.xlu1 %193 }
 0x241   :  { %v195_v12 = vmul.f32 0.03125, %v194_v11 }
 0x243   :  { %v200_v14 = vmul.f32 %v195_v12, %v195_v12  ;;  %v202_v24 = vsub.f32 %v192_v57, %v195_v12 }
 0x248   :  { %v198_v13 = vpop.xlane.xlu1 %197 }
 0x249   :  { %v199_v15 = vmul.f32 0.03125, %v198_v13 }
 0x24b   :  { %v201_v16 = vsub.f32 %v199_v15, %v200_v14 }
 0x24d   :  { %v203_v17 = vadd.f32 1e-05, %v201_v16 }
 0x24f   :  { %287 = vrsqrt.f32 %v203_v17  ;;  %vm210_vm4 = vweird.f32 %v203_v17 }
 0x255   :  { %v288_v18 = vpop.eup %287 }
 0x256   :  { %v205_v19 = vmul.f32 %v288_v18, %v203_v17  ;;  %vm211_vm3 = vweird.f32 %v288_v18 }
 0x257   :  { %vm212_vm5 = vmor %vm210_vm4, %vm211_vm3 }
 0x258   :  { %v206_v20 = vmul.f32 %v288_v18, %v205_v19 }
 0x25a   :  { %v207_v21 = vmul.f32 0.5, %v206_v20 }
 0x25c   :  { %v208_v22 = vsub.f32 1.5, %v207_v21 }
 0x25e   :  { %v209_v23 = vmul.f32 %v288_v18, %v208_v22 }
 0x260   :  { %v213_v25 = vsel %vm212_vm5, %v288_v18, %v209_v23 }
 0x261   :  { %v214_v26 = vmul.f32 %v213_v25, %v202_v24 }
 0x263   :  { %251 = vmatmul.f32.vlgmr.msra.gmra.mxu2 %v214_v26 }
 0x2e6   :  { %v252_v28 = vpop.f32.mrf.mxu2 }
 0x2e7   :  { %v253_v29 = vadd.f32 %v284_v27, %v252_v28 }
 0x2e9   :  { %255 = vst [vmem:[#allocation10] sm:$0xff] %v253_v29 }
 0x2ea   :  { %266 = dma.vmem_to_hbm [thread:$0]  %s262_s24, 128, %s264_s27, [#allocation4]  }
 0x2eb   :  { %415 = dma.done.wait [#allocation4], 128  }
 0x2ec   :  { %416 = vsyncadd [#allocation4], 4294967168 }
 0x2ed   :  { %271 = vsyncpa [#allocation3], 1 }
 0x2ee   :  { %272 = vsyncpa [#allocation6], 1 }
 0x2ef   :  { %273 = vsyncpa [#allocation9], 1 }
 0x2f0   :  { %274 = vsyncpa [#allocation4], 1 }

</bundles_post_ra>
